<compile_context>
chip_gen: v7x
topology: tpu7x:2x2x1
jax: 0.10.0
libtpu: 0.0.40
codegen_flags: <defaults>
</compile_context>

<pallas_src>
import functools

import jax
import jax.numpy as jnp
from jax import lax
from jax.experimental import pallas as pl
from jax.experimental.pallas import tpu as pltpu

LANES = 128
SUBLANES_F32 = 8            # f32 accumulator sublane tile
DEFAULT_MAX_ROW_TILE = 4096  # (4096, 128) f32 tile = 2 MiB; safe on every gen
NUM_CORE_SPLIT = 2           # leading "parallel" axis; engages both v7x TCs


def _mse_sum_kernel(x_ref, y_ref, o_ref, *scratch, rows, row_tile,
                    steps_per_core, needs_mask, whole_tile_sum):
    # Cast after the native-dtype VMEM load (VPU slack, no extra HBM traffic).
    d = x_ref[...].astype(jnp.float32) - y_ref[...].astype(jnp.float32)
    dd = d * d

    if whole_tile_sum:
        # grid == (1, 1): one block covers the whole (lane-padded) array and
        # the zero lane-padding contributes 0, so reduce straight to SMEM.
        o_ref[0, 0] = jnp.sum(dd)
        return

    acc_ref, = scratch
    c = pl.program_id(0)
    i = pl.program_id(1)

    @pl.when(i == 0)
    def _init():
        acc_ref[...] = jnp.zeros_like(acc_ref)

    def _accum(vals):
        # VPU-only partial reduce into one (8, 128) vreg: whole (8, 128)
        # sublane tiles are summed elementwise; the single cross-lane/XLU
        # reduce happens exactly once at finalize.
        acc_ref[...] += jnp.sum(
            vals.reshape(row_tile // SUBLANES_F32, SUBLANES_F32, LANES), axis=0)

    if needs_mask:
        block_idx = c * steps_per_core + i
        has_invalid_rows = (block_idx + 1) * row_tile > rows

        @pl.when(jnp.logical_not(has_invalid_rows))
        def _plain():
            _accum(dd)

        @pl.when(has_invalid_rows)
        def _masked():
            # Ragged (or fully out-of-range, clamped-DMA) block: zero rows past
            # `rows`. Runs on at most the last two blocks of the second core.
            row_ids = block_idx * row_tile + lax.broadcasted_iota(
                jnp.int32, (row_tile, LANES), 0)
            _accum(jnp.where(row_ids < rows, dd, 0.0))
    else:
        _accum(dd)

    @pl.when(i == pl.num_programs(1) - 1)
    def _finalize():
        # Single cross-lane reduce + scalar SMEM store per core.
        o_ref[0, 0] = jnp.sum(acc_ref[...])


@functools.partial(jax.jit, static_argnames=("max_row_tile",))
def lp_l2_loss(x, y, *, max_row_tile=DEFAULT_MAX_ROW_TILE):
    """sum((x - y)**2) / batch_size, matching nn.MSELoss(reduction='sum') / b."""
    b = x.shape[0]
    xf = x.reshape(-1)   # keep native dtype; f32 cast happens inside the kernel
    yf = y.reshape(-1)
    n = xf.shape[0]

    # Dtype-aware sublane packing: 8 (4-byte), 16 (2-byte), 32 (1-byte).
    itemsize = min(jnp.dtype(x.dtype).itemsize, jnp.dtype(y.dtype).itemsize)
    sub = 32 // itemsize

    # Pad only to a 128-lane multiple, and only when needed. Zero padding
    # contributes 0 to the sum of squares; aligned inputs see no HBM copy.
    n_pad = pl.cdiv(n, LANES) * LANES
    if n_pad != n:
        xf = jnp.pad(xf, (0, n_pad - n))
        yf = jnp.pad(yf, (0, n_pad - n))
    rows = n_pad // LANES

    x2d = xf.reshape(rows, LANES)
    y2d = yf.reshape(rows, LANES)

    # Tile rows: must be a multiple of the packing factor, unless the block
    # spans the full row dim (always legal).
    max_row_tile = max(sub, (max_row_tile // sub) * sub)
    if rows % sub == 0:
        row_tile = min(max_row_tile, rows)
    else:
        row_tile = rows if rows <= max_row_tile else max_row_tile

    steps_total = pl.cdiv(rows, row_tile)
    whole_tile_sum = steps_total == 1

    cores = 1 if whole_tile_sum else NUM_CORE_SPLIT
    steps_per_core = pl.cdiv(steps_total, cores)
    needs_mask = (cores * steps_per_core * row_tile) != rows

    def block_map(c, i):
        # Clamp so the (at most one) fully out-of-range block of the second
        # core re-reads the last valid block; its rows are masked to zero.
        return (jnp.minimum(c * steps_per_core + i, steps_total - 1), 0)

    kernel = functools.partial(
        _mse_sum_kernel,
        rows=rows,
        row_tile=row_tile,
        steps_per_core=steps_per_core,
        needs_mask=needs_mask,
        whole_tile_sum=whole_tile_sum,
    )

    # TODO(synk): if an xprof trace on very large inputs shows DMA gaps, try
    # pipeline_mode=pl.Buffered(3) on the two input BlockSpecs.
    partials = pl.pallas_call(
        kernel,
        out_shape=jax.ShapeDtypeStruct((cores, 1), jnp.float32),
        grid_spec=pltpu.PrefetchScalarGridSpec(
            num_scalar_prefetch=0,
            grid=(cores, steps_per_core),
            in_specs=[
                pl.BlockSpec((row_tile, LANES), block_map),
                pl.BlockSpec((row_tile, LANES), block_map),
            ],
            out_specs=pl.BlockSpec(
                (1, 1), lambda c, i: (c, 0), memory_space=pltpu.SMEM
            ),
            scratch_shapes=(
                [] if whole_tile_sum
                else [pltpu.VMEM((SUBLANES_F32, LANES), jnp.float32)]
            ),
        ),
        compiler_params=pltpu.CompilerParams(
            dimension_semantics=("parallel", "arbitrary"),
        ),
    )(x2d, y2d)

    return jnp.sum(partials) / jnp.float32(b)


def _ref_loss(x, y):
    return jnp.sum((x.astype(jnp.float32) - y.astype(jnp.float32)) ** 2) / x.shape[0]


if __name__ == "__main__":
    key = jax.random.PRNGKey(0)
    kx, ky, ka, kb, kc, kd, ke, kf = jax.random.split(key, 8)

    # Primary case: typical NCHW input (B, C, H, W) = (2, 4, 16, 16) -> single
    # full-array block (whole_tile_sum path), no padding.
    x = jax.random.normal(kx, (2, 4, 16, 16), dtype=jnp.float32)
    y = jax.random.normal(ky, (2, 4, 16, 16), dtype=jnp.float32)
    loss = lp_l2_loss(x, y)
    jax.block_until_ready(loss)
    assert jnp.allclose(loss, _ref_loss(x, y), rtol=1e-5, atol=1e-5)

    # Multi-step + dual-core split with an odd block count (exercises the
    # clamped fully-out-of-range block + masked accumulate): 24 rows, tile 8.
    x2 = jax.random.normal(ka, (2, 4, 16, 24), dtype=jnp.float32)
    y2 = jax.random.normal(kb, (2, 4, 16, 24), dtype=jnp.float32)
    loss2 = lp_l2_loss(x2, y2, max_row_tile=8)
    assert jnp.allclose(loss2, _ref_loss(x2, y2), rtol=1e-5, atol=1e-5)

    # Multi-step with a ragged last block on the second core: 24 rows, tile 16.
    loss2b = lp_l2_loss(x2, y2, max_row_tile=16)
    assert jnp.allclose(loss2b, _ref_loss(x2, y2), rtol=1e-5, atol=1e-5)

    # Unaligned (lane-padding) path with rows not a multiple of 8:
    # 2*3*7*11 = 462 elems -> padded to 512 -> 4 rows, full-dim block.
    x3 = jax.random.normal(kc, (2, 3, 7, 11), dtype=jnp.float32)
    y3 = jax.random.normal(kd, (2, 3, 7, 11), dtype=jnp.float32)
    loss3 = lp_l2_loss(x3, y3)
    assert jnp.allclose(loss3, _ref_loss(x3, y3), rtol=1e-5, atol=1e-5)

    # bf16 native-dtype streaming with dtype-aware packing (tile 16, 3 blocks,
    # ragged + out-of-range handling): 2*4*16*40 = 5120 elems -> 40 rows.
    x4 = jax.random.normal(ke, (2, 4, 16, 40), dtype=jnp.bfloat16)
    y4 = jax.random.normal(kf, (2, 4, 16, 40), dtype=jnp.bfloat16)
    loss4 = lp_l2_loss(x4, y4, max_row_tile=16)
    assert jnp.allclose(loss4, _ref_loss(x4, y4), rtol=1e-5, atol=1e-5)

    jax.block_until_ready((loss, loss2, loss2b, loss3, loss4))
    print("KERNEL_OK")
</pallas_src>

<mosaic_0001>
module attributes {stable_mosaic.version = 11 : i64} {
  func.func @_mse_sum_kernel(%arg0: i32, %arg1: i32, %arg2: memref<16x128xf32, #tpu.memory_space<vmem>>, %arg3: memref<16x128xf32, #tpu.memory_space<vmem>>, %arg4: memref<1x1xf32, #tpu.memory_space<smem>>) attributes {dimension_semantics = [#tpu.dimension_semantics<parallel>, #tpu.dimension_semantics<arbitrary>], iteration_bounds = array<i64: 1, 1>, scalar_prefetch = 0 : i64, scratch_operands = 0 : i64, tpu.core_type = #tpu.core_type<tc>, window_params = [{transform_indices = @transform_0, window_bounds = array<i64: 16, 128>}, {transform_indices = @transform_1, window_bounds = array<i64: 16, 128>}, {transform_indices = @transform_2, window_bounds = array<i64: 1, 1>}]} {
    %c0 = arith.constant 0 : index
    %c0_0 = arith.constant 0 : index
    %0 = vector.load %arg2[%c0, %c0_0] : memref<16x128xf32, #tpu.memory_space<vmem>>, vector<16x128xf32>
    %c0_1 = arith.constant 0 : index
    %c0_2 = arith.constant 0 : index
    %1 = vector.load %arg3[%c0_1, %c0_2] : memref<16x128xf32, #tpu.memory_space<vmem>>, vector<16x128xf32>
    %2 = arith.subf %0, %1 : vector<16x128xf32>
    %3 = arith.mulf %2, %2 : vector<16x128xf32>
    %4 = vector.shape_cast %3 : vector<16x128xf32> to vector<1x16x128xf32>
    %cst = arith.constant dense<0.000000e+00> : vector<1xf32>
    %5 = vector.multi_reduction <add>, %4, %cst [1, 2] : vector<1x16x128xf32> to vector<1xf32>
    %6 = vector.shape_cast %5 : vector<1xf32> to vector<1x1x1xf32>
    %7 = vector.extract %6[0, 0, 0] : f32 from vector<1x1x1xf32>
    %c0_3 = arith.constant 0 : index
    %c0_4 = arith.constant 0 : index
    %8 = memref.load %arg4[%c0_3, %c0_4] : memref<1x1xf32, #tpu.memory_space<smem>>
    memref.store %7, %arg4[%c0_3, %c0_4] : memref<1x1xf32, #tpu.memory_space<smem>>
    return
  }
  func.func @transform_0(%arg0: i32, %arg1: i32) -> (i32, i32) {
    %c1_i32 = arith.constant 1 : i32
    %0 = arith.muli %arg0, %c1_i32 : i32
    %1 = arith.addi %0, %arg1 : i32
    %c0_i32 = arith.constant 0 : i32
    %2 = arith.minsi %1, %c0_i32 : i32
    %c0_i32_0 = arith.constant 0 : i32
    %c0_i32_1 = arith.constant 0 : i32
    return %2, %c0_i32_0 : i32, i32
  }
  func.func @transform_1(%arg0: i32, %arg1: i32) -> (i32, i32) {
    %c1_i32 = arith.constant 1 : i32
    %0 = arith.muli %arg0, %c1_i32 : i32
    %1 = arith.addi %0, %arg1 : i32
    %c0_i32 = arith.constant 0 : i32
    %2 = arith.minsi %1, %c0_i32 : i32
    %c0_i32_0 = arith.constant 0 : i32
    %c0_i32_1 = arith.constant 0 : i32
    return %2, %c0_i32_0 : i32, i32
  }
  func.func @transform_2(%arg0: i32, %arg1: i32) -> (i32, i32) {
    %c0_i32 = arith.constant 0 : i32
    %c0_i32_0 = arith.constant 0 : i32
    return %arg0, %c0_i32 : i32, i32
  }
}

</mosaic_0001>

<bundles_post_ra>
// kernel: lp_l2_loss.1
= control target key start
LH: loop header
LB: loop body
LE: loop exit
PB: predicated region body
PF: predicated region fallthrough
CT: control target
= control target key end

     0   :  { %s176_s0 = inlined_call_operand.vmem [shape: f32[16,128], index: 0, kind: input, shape index: {}]   ;;  %s177_s1 = inlined_call_operand.vmem [shape: f32[16,128], index: 1, kind: input, shape index: {}]   ;;  %s178_s2 = inlined_call_operand.hbm [shape: f32[1,1], index: 2, kind: output, shape index: {}]  }
   0x1   :  { %v76_v0 = vld [vmem:[%s176_s0] sm:$0xff]  ;;  %v77_v1 = vld [vmem:[%s176_s0 + $0x8] sm:$0xff] }
   0x2   :  { %v78_v2 = vld [vmem:[%s177_s1] sm:$0xff]  ;;  %v79_v3 = vld [vmem:[%s177_s1 + $0x8] sm:$0xff] }
   0x3   :  { %v80_v4 = vsub.f32 %v76_v0, %v78_v2 }
   0x4   :  { %7 = vsyncpa [#allocation3], 0  ;;  %v81_v5 = vsub.f32 %v77_v1, %v79_v3  ;;  %s124_s1 = scalar_lea.hbm %s178_s2, 16 }
   0x5   :  { %v82_v6 = vmul.f32 %v80_v4, %v80_v4  ;;  %p125_p0 = scmp.ne.s32.totalorder %s178_s2, %s124_s1  ;;  %p128_p1 = scmp.lt.u32.totalorder %s124_s1, %s178_s2 }
   0x6   :  { %v83_v7 = vmul.f32 %v81_v5, %v81_v5 }
   0x7   :  { %p130_p2 = pnand %p128_p1, %p125_p0 }
   0x8   :  { %v84_v8 = vadd.f32 %v83_v7, %v82_v6 }
   0xa   :  { %85 = vadd.xlane.f32.xlu0 %v84_v8 }
  0x97   :  { %v86_v9 = vpop.xlane.xlu0 %85 }
  0x98   :  { %v87_v10 = vrot.slane %v86_v9, 4 }
  0x9a   :  { %v88_v11 = vadd.f32 %v87_v10, %v86_v9 }
  0x9c   :  { %v89_v12 = vrot.slane %v88_v11, 2 }
  0x9e   :  { %v90_v13 = vadd.f32 %v89_v12, %v88_v11 }
  0xa0   :  { %v91_v14 = vrot.slane %v90_v13, 1 }
  0xa2   :  { %v92_v15 = vadd.f32 %v91_v14, %v90_v13 }
  0xa4   :  { %121 = vpush %v92_v15 }
  0xd5   :  { %s122_s0 = spop %121 }
  0xd6   :  { %95 = sst [smem:[#allocation2]] %s122_s0 }
  0xd7   :  { %133 = shalt.err (!%p130_p2)
}
  0xd8   :  { %s136_s23 = smov [#allocation2]  }
  0xd9   :  { %103 = dma.smem_to_hbm %s136_s23, 16, %s178_s2, [#allocation3]  }
  0xda   :  { %134 = dma.done.wait [#allocation3], 16  }
  0xdb   :  { %135 = vsyncadd [#allocation3], 4294967280 }
  0xdc   :  { %107 = sfence }
  0xdd   :  { %108 = vsyncpa [#allocation3], 1 }

</bundles_post_ra>
